<compile_context>
chip_gen: v6e
topology: v6e:2x2x1
jax: 0.10.0
libtpu: 0.0.40
codegen_flags: <defaults>
</compile_context>

<pallas_src>
import functools

import jax
import jax.numpy as jnp
from jax import lax
from jax.experimental import pallas as pl
from jax.experimental.pallas import tpu as pltpu


def _round_up(x, m):
    return ((x + m - 1) // m) * m


# ----------------------------------------------------------------------------
# Fused kernel: LayerNorm(x + a) -> W1/ReLU -> W2 -> *scale + a
# ----------------------------------------------------------------------------
def _adapter_kernel(x_ref, a_ref, g_ref, bt_ref, w1_ref, b1_ref, w2_ref, b2_ref,
                    sc_ref, o_ref, *, eps):
    # x_ref / a_ref / o_ref : (tm, D) row tile, lane-dense in D.
    # Padded rows of a partial last tile are computed but never written back;
    # row-wise reductions keep them from contaminating valid rows.

    # ---- LayerNorm(x + attn_output), f32 elementwise (v5e-safe) -------------
    s = x_ref[...].astype(jnp.float32) + a_ref[...].astype(jnp.float32)
    mean = jnp.mean(s, axis=-1, keepdims=True)
    c = s - mean
    var = jnp.mean(c * c, axis=-1, keepdims=True)
    inv = lax.rsqrt(var + eps)                                   # EUP rsqrt
    h = c * inv * g_ref[...] + bt_ref[...]                       # gamma/beta f32

    # ---- down-proj + ReLU + up-proj; weights pre-cast, f32 accumulation -----
    mm_dtype = w1_ref.dtype
    h1 = jnp.dot(h.astype(mm_dtype), w1_ref[...],
                 preferred_element_type=jnp.float32)
    h1 = jnp.maximum(h1 + b1_ref[...], 0.0)

    h2 = jnp.dot(h1.astype(mm_dtype), w2_ref[...],
                 preferred_element_type=jnp.float32)
    h2 = h2 + b2_ref[...]

    # ---- scale (SMEM scalar) + residual (re-read a_ref: keeps live set small)
    out = h2 * sc_ref[0, 0] + a_ref[...].astype(jnp.float32)
    o_ref[...] = out.astype(o_ref.dtype)


# ----------------------------------------------------------------------------
# VMEM-aware tile selection
# ----------------------------------------------------------------------------
def _vmem_limit_bytes():
    try:
        cap = int(pltpu.get_tpu_info().vmem_capacity_bytes)
    except Exception:
        cap = 64 * 1024 * 1024          # conservative: v7x per-TC physical VMEM
    return min((cap * 3) // 4, 96 * 1024 * 1024)


def _pick_tile(M, D, down_p, x_itemsize, mm_itemsize, block_m, vmem_limit):
    sub = 16 if x_itemsize == 2 else 8          # sublane packing (bf16 vs f32)

    # Double-buffered params (worst case) + small vectors.
    param_bytes = 2 * ((D * down_p + down_p * D) * mm_itemsize
                       + (3 * D + down_p) * 4)
    # Per-row: double-buffered x/a/out tiles + f32 working set (s/h, h2, h1).
    per_row = 3 * 2 * D * x_itemsize + (2 * D + down_p) * 4
    budget = max(vmem_limit - param_bytes - (4 << 20), sub * per_row)
    tm_cap = max(sub, (budget // per_row) // sub * sub)

    tm = min(block_m, tm_cap)
    if M > sub:
        # Guarantee >= 2 grid steps so "parallel" shards across v7x's two TCs.
        tm = min(tm, _round_up(pl.cdiv(M, 2), sub))
    tm = max(tm, min(M, sub))
    if M <= tm:
        tm = M                                   # single full-extent block
    return tm


# ----------------------------------------------------------------------------
# Wrapper
# ----------------------------------------------------------------------------
def adapter_forward(params, x, attn_output, *, eps=1e-5, block_m=1024,
                    matmul_dtype=jnp.bfloat16):
    """Adapter.forward(x, attn_output).  x/attn_output: (B, N, D)."""
    B, N, D = x.shape
    M = B * N
    down = params["w1"].shape[1]
    down_p = max(128, _round_up(down, 128))      # lane-dense bottleneck dim

    x2 = x.reshape(M, D)
    a2 = attn_output.reshape(M, D)

    # LN params / biases stay f32 (the f32 elementwise path consumes them).
    gamma = params["ln_gamma"].reshape(1, D).astype(jnp.float32)
    beta = params["ln_beta"].reshape(1, D).astype(jnp.float32)
    b2 = params["b2"].reshape(1, D).astype(jnp.float32)
    scaling = params["scaling"].reshape(1, 1).astype(jnp.float32)

    # Zero-pad bottleneck to down_p (numerically exact) and pre-cast weights
    # to the MXU operand dtype once, outside the kernel.
    w1 = params["w1"]
    w2 = params["w2"]
    b1 = params["b1"]
    if down_p != down:
        w1 = jnp.pad(w1, ((0, 0), (0, down_p - down)))
        b1 = jnp.pad(b1, (0, down_p - down))
        w2 = jnp.pad(w2, ((0, down_p - down), (0, 0)))
    w1 = w1.astype(matmul_dtype)
    w2 = w2.astype(matmul_dtype)
    b1 = b1.reshape(1, down_p).astype(jnp.float32)

    x_item = jnp.dtype(x.dtype).itemsize
    mm_item = jnp.dtype(matmul_dtype).itemsize
    vmem_limit = _vmem_limit_bytes()
    tm = _pick_tile(M, D, down_p, x_item, mm_item, block_m, vmem_limit)
    grid = (pl.cdiv(M, tm),)

    row = lambda i: (i, 0)   # row tiles walk the grid
    rep = lambda i: (0, 0)   # params: same block every step -> VMEM-resident

    cost = pl.CostEstimate(
        flops=int(4 * M * D * down_p + 10 * M * D),
        transcendentals=int(M),
        bytes_accessed=int(3 * M * D * x_item + 2 * D * down_p * mm_item
                           + (3 * D + down_p) * 4),
    )

    kernel = functools.partial(_adapter_kernel, eps=eps)

    out2 = pl.pallas_call(
        kernel,
        out_shape=jax.ShapeDtypeStruct((M, D), x.dtype),
        grid=grid,
        in_specs=[
            pl.BlockSpec((tm, D), row),          # x tile
            pl.BlockSpec((tm, D), row),          # attn_output tile (residual)
            pl.BlockSpec((1, D), rep),           # LN gamma (f32)
            pl.BlockSpec((1, D), rep),           # LN beta  (f32)
            pl.BlockSpec((D, down_p), rep),      # W1 (down proj, matmul_dtype)
            pl.BlockSpec((1, down_p), rep),      # b1 (f32)
            pl.BlockSpec((down_p, D), rep),      # W2 (up proj, matmul_dtype)
            pl.BlockSpec((1, D), rep),           # b2 (f32)
            pl.BlockSpec(memory_space=pltpu.MemorySpace.SMEM),  # scaling scalar
        ],
        out_specs=pl.BlockSpec((tm, D), row),
        compiler_params=pltpu.CompilerParams(
            dimension_semantics=("parallel",),   # megacore sharding on v7x
            vmem_limit_bytes=vmem_limit,         # adaptive, v7x-safe
        ),
        cost_estimate=cost,
    )(x2, a2, gamma, beta, w1, b1, w2, b2, scaling)

    return out2.reshape(B, N, D)


# ----------------------------------------------------------------------------
# Pure-JAX reference (numerical verification)
# ----------------------------------------------------------------------------
def adapter_reference(params, x, attn_output, eps=1e-5):
    s = x + attn_output
    mean = jnp.mean(s, axis=-1, keepdims=True)
    var = jnp.mean((s - mean) ** 2, axis=-1, keepdims=True)
    h = (s - mean) / jnp.sqrt(var + eps) * params["ln_gamma"] + params["ln_beta"]
    h = jnp.maximum(h @ params["w1"] + params["b1"], 0.0)
    h = h @ params["w2"] + params["b2"]
    return h * params["scaling"] + attn_output


# ----------------------------------------------------------------------------
if __name__ == "__main__":
    key = jax.random.PRNGKey(0)

    B, N = 2, 16
    input_dim = 128      # lane-dense channel dim (multiple of 128)
    down_dim = 64        # adapter bottleneck (gets zero-padded to 128)

    ks = jax.random.split(key, 8)
    x = jax.random.normal(ks[0], (B, N, input_dim), dtype=jnp.float32)
    attn_output = jax.random.normal(ks[1], (B, N, input_dim), dtype=jnp.float32)

    params = {
        "ln_gamma": jnp.ones((input_dim,), jnp.float32)
                    + 0.02 * jax.random.normal(ks[2], (input_dim,), jnp.float32),
        "ln_beta": 0.02 * jax.random.normal(ks[3], (input_dim,), jnp.float32),
        "w1": 0.05 * jax.random.normal(ks[4], (input_dim, down_dim), jnp.float32),
        "b1": 0.02 * jax.random.normal(ks[5], (down_dim,), jnp.float32),
        "w2": 0.05 * jax.random.normal(ks[6], (down_dim, input_dim), jnp.float32),
        "b2": 0.02 * jax.random.normal(ks[7], (input_dim,), jnp.float32),
        # nn.Parameter(torch.zeros(1)) -> 0 at init; use nonzero so the full
        # LN->MLP->scale->residual path is actually exercised.
        "scaling": jnp.full((1,), 0.5, jnp.float32),
    }

    ref = adapter_reference(params, x, attn_output)

    # Default path: bf16 MXU operands, f32 accumulation (loose tolerance vs f32 ref).
    # The >=2-grid-step rule makes this a tiled run (tm=16, grid=(2,)) at toy size.
    fwd = jax.jit(adapter_forward)
    out = jax.block_until_ready(fwd(params, x, attn_output))
    assert out.shape == (B, N, input_dim)
    assert jnp.allclose(out, ref, atol=5e-2, rtol=5e-2), "bf16 path mismatch vs reference"

    # f32-operand path: near-exact check of the fused kernel's structure.
    fwd_f32 = jax.jit(functools.partial(adapter_forward, matmul_dtype=jnp.float32))
    out32 = jax.block_until_ready(fwd_f32(params, x, attn_output))
    assert jnp.allclose(out32, ref, atol=1e-4, rtol=1e-4), "f32 path mismatch vs reference"

    print("KERNEL_OK")
</pallas_src>

<mosaic_0001>
module attributes {stable_mosaic.version = 11 : i64} {
  func.func @_adapter_kernel(%arg0: i32, %arg1: memref<16x128xf32, #tpu.memory_space<vmem>>, %arg2: memref<16x128xf32, #tpu.memory_space<vmem>>, %arg3: memref<1x128xf32, #tpu.memory_space<vmem>>, %arg4: memref<1x128xf32, #tpu.memory_space<vmem>>, %arg5: memref<128x128xbf16, #tpu.memory_space<vmem>>, %arg6: memref<1x128xf32, #tpu.memory_space<vmem>>, %arg7: memref<128x128xbf16, #tpu.memory_space<vmem>>, %arg8: memref<1x128xf32, #tpu.memory_space<vmem>>, %arg9: memref<1x1xf32, #tpu.memory_space<smem>>, %arg10: memref<16x128xf32, #tpu.memory_space<vmem>>) attributes {dimension_semantics = [#tpu.dimension_semantics<parallel>], iteration_bounds = array<i64: 2>, scalar_prefetch = 0 : i64, scratch_operands = 0 : i64, tpu.core_type = #tpu.core_type<tc>, window_params = [{transform_indices = @transform_0, window_bounds = array<i64: 16, 128>}, {transform_indices = @transform_1, window_bounds = array<i64: 16, 128>}, {pipeline_mode = #tpu.pipeline_mode<synchronous>, transform_indices = @transform_2, window_bounds = array<i64: 1, 128>}, {pipeline_mode = #tpu.pipeline_mode<synchronous>, transform_indices = @transform_3, window_bounds = array<i64: 1, 128>}, {pipeline_mode = #tpu.pipeline_mode<synchronous>, transform_indices = @transform_4, window_bounds = array<i64: 128, 128>}, {pipeline_mode = #tpu.pipeline_mode<synchronous>, transform_indices = @transform_5, window_bounds = array<i64: 1, 128>}, {pipeline_mode = #tpu.pipeline_mode<synchronous>, transform_indices = @transform_6, window_bounds = array<i64: 128, 128>}, {pipeline_mode = #tpu.pipeline_mode<synchronous>, transform_indices = @transform_7, window_bounds = array<i64: 1, 128>}, {transform_indices = @transform_8, window_bounds = array<i64: 1, 1>}, {transform_indices = @transform_9, window_bounds = array<i64: 16, 128>}]} {
    %c0 = arith.constant 0 : index
    %c0_0 = arith.constant 0 : index
    %0 = vector.load %arg1[%c0, %c0_0] : memref<16x128xf32, #tpu.memory_space<vmem>>, vector<16x128xf32>
    %c0_1 = arith.constant 0 : index
    %c0_2 = arith.constant 0 : index
    %1 = vector.load %arg2[%c0_1, %c0_2] : memref<16x128xf32, #tpu.memory_space<vmem>>, vector<16x128xf32>
    %2 = arith.addf %0, %1 : vector<16x128xf32>
    %cst = arith.constant dense<0.000000e+00> : vector<16xf32>
    %3 = vector.multi_reduction <add>, %2, %cst [1] : vector<16x128xf32> to vector<16xf32>
    %4 = vector.shape_cast %3 : vector<16xf32> to vector<16x1xf32>
    %cst_3 = arith.constant 1.280000e+02 : f32
    %5 = vector.broadcast %cst_3 : f32 to vector<16x1xf32>
    %6 = arith.divf %4, %5 : vector<16x1xf32>
    %7 = vector.broadcast %6 : vector<16x1xf32> to vector<16x128xf32>
    %8 = arith.subf %2, %7 : vector<16x128xf32>
    %9 = arith.mulf %8, %8 : vector<16x128xf32>
    %cst_4 = arith.constant dense<0.000000e+00> : vector<16xf32>
    %10 = vector.multi_reduction <add>, %9, %cst_4 [1] : vector<16x128xf32> to vector<16xf32>
    %11 = vector.shape_cast %10 : vector<16xf32> to vector<16x1xf32>
    %cst_5 = arith.constant 1.280000e+02 : f32
    %12 = vector.broadcast %cst_5 : f32 to vector<16x1xf32>
    %13 = arith.divf %11, %12 : vector<16x1xf32>
    %cst_6 = arith.constant 9.99999974E-6 : f32
    %14 = vector.broadcast %cst_6 : f32 to vector<16x1xf32>
    %15 = arith.addf %13, %14 : vector<16x1xf32>
    %16 = math.rsqrt %15 : vector<16x1xf32>
    %17 = vector.broadcast %16 : vector<16x1xf32> to vector<16x128xf32>
    %18 = arith.mulf %8, %17 : vector<16x128xf32>
    %c0_7 = arith.constant 0 : index
    %c0_8 = arith.constant 0 : index
    %19 = vector.load %arg3[%c0_7, %c0_8] : memref<1x128xf32, #tpu.memory_space<vmem>>, vector<1x128xf32>
    %20 = vector.broadcast %19 : vector<1x128xf32> to vector<16x128xf32>
    %21 = arith.mulf %18, %20 : vector<16x128xf32>
    %c0_9 = arith.constant 0 : index
    %c0_10 = arith.constant 0 : index
    %22 = vector.load %arg4[%c0_9, %c0_10] : memref<1x128xf32, #tpu.memory_space<vmem>>, vector<1x128xf32>
    %23 = vector.broadcast %22 : vector<1x128xf32> to vector<16x128xf32>
    %24 = arith.addf %21, %23 : vector<16x128xf32>
    %25 = arith.truncf %24 : vector<16x128xf32> to vector<16x128xbf16>
    %c0_11 = arith.constant 0 : index
    %c0_12 = arith.constant 0 : index
    %26 = vector.load %arg5[%c0_11, %c0_12] : memref<128x128xbf16, #tpu.memory_space<vmem>>, vector<128x128xbf16>
    %cst_13 = arith.constant dense<0.000000e+00> : vector<16x128xf32>
    %27 = tpu.matmul %25, %26, %cst_13 {dimension_numbers = #tpu.dot_dimension_numbers<[1], [0], [0], [1], [0, 0, 1, 1], [], []>} : vector<16x128xbf16>, vector<128x128xbf16>, vector<16x128xf32> -> vector<16x128xf32>
    %c0_14 = arith.constant 0 : index
    %c0_15 = arith.constant 0 : index
    %28 = vector.load %arg6[%c0_14, %c0_15] : memref<1x128xf32, #tpu.memory_space<vmem>>, vector<1x128xf32>
    %29 = vector.broadcast %28 : vector<1x128xf32> to vector<16x128xf32>
    %30 = arith.addf %27, %29 : vector<16x128xf32>
    %cst_16 = arith.constant 0.000000e+00 : f32
    %31 = vector.broadcast %cst_16 : f32 to vector<16x128xf32>
    %32 = arith.maximumf %30, %31 : vector<16x128xf32>
    %33 = arith.truncf %32 : vector<16x128xf32> to vector<16x128xbf16>
    %c0_17 = arith.constant 0 : index
    %c0_18 = arith.constant 0 : index
    %34 = vector.load %arg7[%c0_17, %c0_18] : memref<128x128xbf16, #tpu.memory_space<vmem>>, vector<128x128xbf16>
    %cst_19 = arith.constant dense<0.000000e+00> : vector<16x128xf32>
    %35 = tpu.matmul %33, %34, %cst_19 {dimension_numbers = #tpu.dot_dimension_numbers<[1], [0], [0], [1], [0, 0, 1, 1], [], []>} : vector<16x128xbf16>, vector<128x128xbf16>, vector<16x128xf32> -> vector<16x128xf32>
    %c0_20 = arith.constant 0 : index
    %c0_21 = arith.constant 0 : index
    %36 = vector.load %arg8[%c0_20, %c0_21] : memref<1x128xf32, #tpu.memory_space<vmem>>, vector<1x128xf32>
    %37 = vector.broadcast %36 : vector<1x128xf32> to vector<16x128xf32>
    %38 = arith.addf %35, %37 : vector<16x128xf32>
    %c0_22 = arith.constant 0 : index
    %c0_23 = arith.constant 0 : index
    %39 = memref.load %arg9[%c0_22, %c0_23] : memref<1x1xf32, #tpu.memory_space<smem>>
    %40 = vector.broadcast %39 : f32 to vector<16x128xf32>
    %41 = arith.mulf %38, %40 : vector<16x128xf32>
    %c0_24 = arith.constant 0 : index
    %c0_25 = arith.constant 0 : index
    %42 = vector.load %arg2[%c0_24, %c0_25] : memref<16x128xf32, #tpu.memory_space<vmem>>, vector<16x128xf32>
    %43 = arith.addf %41, %42 : vector<16x128xf32>
    %c0_26 = arith.constant 0 : index
    %c0_27 = arith.constant 0 : index
    %44 = vector.load %arg10[%c0_26, %c0_27] : memref<16x128xf32, #tpu.memory_space<vmem>>, vector<16x128xf32>
    tpu.vector_store %arg10[%c0_26, %c0_27], %43 {strides = array<i32>} : memref<16x128xf32, #tpu.memory_space<vmem>>, vector<16x128xf32>,
    return
  }
  func.func @transform_0(%arg0: i32) -> (i32, i32) {
    %c0_i32 = arith.constant 0 : i32
    %c0_i32_0 = arith.constant 0 : i32
    return %arg0, %c0_i32 : i32, i32
  }
  func.func @transform_1(%arg0: i32) -> (i32, i32) {
    %c0_i32 = arith.constant 0 : i32
    %c0_i32_0 = arith.constant 0 : i32
    return %arg0, %c0_i32 : i32, i32
  }
  func.func @transform_2(%arg0: i32) -> (i32, i32) {
    %c0_i32 = arith.constant 0 : i32
    %c0_i32_0 = arith.constant 0 : i32
    %c0_i32_1 = arith.constant 0 : i32
    return %c0_i32, %c0_i32_0 : i32, i32
  }
  func.func @transform_3(%arg0: i32) -> (i32, i32) {
    %c0_i32 = arith.constant 0 : i32
    %c0_i32_0 = arith.constant 0 : i32
    %c0_i32_1 = arith.constant 0 : i32
    return %c0_i32, %c0_i32_0 : i32, i32
  }
  func.func @transform_4(%arg0: i32) -> (i32, i32) {
    %c0_i32 = arith.constant 0 : i32
    %c0_i32_0 = arith.constant 0 : i32
    %c0_i32_1 = arith.constant 0 : i32
    return %c0_i32, %c0_i32_0 : i32, i32
  }
  func.func @transform_5(%arg0: i32) -> (i32, i32) {
    %c0_i32 = arith.constant 0 : i32
    %c0_i32_0 = arith.constant 0 : i32
    %c0_i32_1 = arith.constant 0 : i32
    return %c0_i32, %c0_i32_0 : i32, i32
  }
  func.func @transform_6(%arg0: i32) -> (i32, i32) {
    %c0_i32 = arith.constant 0 : i32
    %c0_i32_0 = arith.constant 0 : i32
    %c0_i32_1 = arith.constant 0 : i32
    return %c0_i32, %c0_i32_0 : i32, i32
  }
  func.func @transform_7(%arg0: i32) -> (i32, i32) {
    %c0_i32 = arith.constant 0 : i32
    %c0_i32_0 = arith.constant 0 : i32
    %c0_i32_1 = arith.constant 0 : i32
    return %c0_i32, %c0_i32_0 : i32, i32
  }
  func.func @transform_8(%arg0: i32) -> (i32, i32) {
    %c0_i32 = arith.constant 0 : i32
    %c0_i32_0 = arith.constant 0 : i32
    %c0_i32_1 = arith.constant 0 : i32
    return %c0_i32, %c0_i32_0 : i32, i32
  }
  func.func @transform_9(%arg0: i32) -> (i32, i32) {
    %c0_i32 = arith.constant 0 : i32
    %c0_i32_0 = arith.constant 0 : i32
    return %arg0, %c0_i32 : i32, i32
  }
}

</mosaic_0001>

<bundles_post_ra>
// kernel: adapter_forward.1
= control target key start
LH: loop header
LB: loop body
LE: loop exit
PB: predicated region body
PF: predicated region fallthrough
CT: control target
= control target key end

     0   :  { %s1195_s0 = inlined_call_operand.vmem [shape: f32[32,128], index: 0, kind: input, shape index: {}]   ;;  %s1196_s1 = inlined_call_operand.vmem [shape: f32[32,128], index: 1, kind: input, shape index: {}]   ;;  %s1197_s2 = inlined_call_operand.vmem [shape: f32[1,128], index: 2, kind: input, shape index: {}]   ;;  %s1198_s3 = inlined_call_operand.vmem [shape: f32[1,128], index: 3, kind: input, shape index: {}]   ;;  %s1199_s4 = inlined_call_operand.vmem [shape: bf16[128,128], index: 4, kind: input, shape index: {}]   ;;  %s1200_s5 = inlined_call_operand.vmem [shape: f32[1,128], index: 5, kind: input, shape index: {}]   ;;  %s1201_s6 = inlined_call_operand.vmem [shape: bf16[128,128], index: 6, kind: input, shape index: {}]   ;;  %s1202_s7 = inlined_call_operand.vmem [shape: f32[1,128], index: 7, kind: input, shape index: {}]   ;;  %s1203_s8 = inlined_call_operand.<no memory space> [shape: f32[1,1], index: 8, kind: input, shape index: {}]   ;;  %s1204_s9 = inlined_call_operand.hbm [shape: f32[32,128], index: 9, kind: output, shape index: {}]  }
   0x1   :  { %14 = sst [smem:[#allocation2]] %s1203_s8 }
   0x2   :  { %15 = vsyncpa [#allocation4], 0 }
   0x3   :  { %17 = vsyncpa [#allocation4 + $0x1], 0  ;;  %s1005_s11 = smov 0   ;;  %s1007_s12 = smov 0  }
   0x4   :  { %s1009_s13 = smov 0   ;;  %s1011_s14 = smov 0  }
   0x5 LB: > { %s1026_s8 = sadd.s32 4294967295, %s945_s14   ;;  %s729_s15 = sadd.s32 4294967294, %s945_s14   ;;  %s945_s14 = sphi %s1011_s14, %s1210_s14   ;;  %s941_s13 = sphi %s1009_s13, %s1209_s13   ;;  %s937_s12 = sphi %s1007_s12, %s1208_s12   ;;  %s933_s11 = sphi %s1005_s11, %s1207_s11  }
   0x6   : > { %s1030_s16 = sadd.s32 1, %s945_s14   ;;  %s229_s17 = sadd.s32 1, %s941_s13 }
   0x7   : > { %s226_s18 = ssub.s32 %s945_s14, %s1030_s16  ;;  %p239_p0 = scmp.ne.s32.totalorder %s941_s13, %s937_s12 }
   0x8   : > { %p227_p1 = scmp.eq.s32.totalorder %s226_s18, 0  ;;  %p240_p2 = scmp.eq.s32.totalorder %s1026_s8, 1 }
   0x9   : > { %p245_p3 = scmp.ne.s32.totalorder %s937_s12, %s933_s11  ;;  %p246_p4 = scmp.eq.s32.totalorder %s729_s15, 1 }
   0xa   : > { %s1041_s19 = scalar_select %p227_p1, %s941_s13, %s229_s17  }
   0xb   : > { %p1043_p5 = por %p240_p2, %p239_p0  ;;  %p1047_p6 = por %p246_p4, %p245_p3 }
   0xc   : > { %p732_p7 = scmp.ge.s32.totalorder %s945_s14, 1  ;;  %p303_p8 = scmp.lt.s32.totalorder %s945_s14, 3 }
   0xe   : > { %p304_p9 = pnand %p732_p7, %p303_p8 }
   0xf   : > { %s734_s22 = sshll.u32 (!%p304_p9), %s1026_s8, 1  ;;  %s341_s30 = sand.u32 (!%p304_p9), 1, %s937_s12  }
  0x10   : > { %307 = sbr.rel (%p304_p9) target bundleno = 760 (0x2f8), region = 56  ;;  %p345_p10 = scmp.lt.s32.totalorder (!%p304_p9), %s734_s22, 3 }
  0x11   : > { %s733_s17 = sshll.u32 (!%p304_p9), %s341_s30, 4  ;;  %s1155_s27 = scalar_lea.sflag (!%p304_p9), [#allocation4], %s341_s30 }
  0x12   : > { %s343_s18 = scalar_lea.vmem (!%p304_p9), [#allocation3], %s733_s17 }
  0x15   : > { %s1212_s22 = smov (!%p345_p10, %s734_s22), 3  ;;  %v865_v6 = vld [vmem:[%s1199_s4 + $0x38] sm:$0xff]   ;;  %v947_v7 = vmov 0.0   ;;  %v866_v16 = vld [vmem:[%s1199_s4 + $0x30] sm:$0xff]   ;;  %v867_v17 = vld [vmem:[%s1199_s4 + $0x28] sm:$0xff]   ;;  %vm948_vm0 = vmmov 0  }
  0x16   : > { %s735_s23 = sshll.u32 %s1212_s22, 3  ;;  %782 = vmatprep.subr.bf16.mxu0 %v947_v7  ;;  %802 = vmatprep.subr.bf16.mxu1 %v947_v7  ;;  %v868_v18 = vld [vmem:[%s1199_s4 + $0x20] sm:$0xff]   ;;  %v869_v19 = vld [vmem:[%s1199_s4 + $0x18] sm:$0xff]   ;;  %v870_v20 = vld [vmem:[%s1199_s4 + $0x10] sm:$0xff]   ;;  %s655_s22 = sshll.u32 %s343_s18, 4  ;;  %s1147_s22 = int_to_ptr.vmem [resolvable:$true] %s655_s22 }
  0x17   : > { %s348_s26 = scalar_lea.vmem %s1195_s0, %s735_s23  ;;  %s354_s29 = scalar_lea.vmem %s1196_s1, %s735_s23  ;;  %783 = vmatpush3.bf16.msra.mxu0 %v865_v6  ;;  %798 = vmatprep.mubr.msk.bf16.mxu0 %vm948_vm0, %v947_v7  ;;  %v871_v21 = vld [vmem:[%s1199_s4 + $0x8] sm:$0xff]   ;;  %v872_v22 = vld [vmem:[%s1199_s4] sm:$0xff]   ;;  %v873_v23 = vld [vmem:[%s1201_s6 + $0x38] sm:$0xff]  }
  0x18   : > { %v358_v0 = vld [vmem:[%s348_s26] sm:$0xff]  ;;  %v359_v2 = vld [vmem:[%s348_s26 + $0x8] sm:$0xff]  ;;  %784 = vmatprep.subr.bf16.mxu0 %v947_v7  ;;  %818 = vmatprep.mubr.msk.bf16.mxu1 %vm948_vm0, %v947_v7  ;;  %v874_v24 = vld [vmem:[%s1201_s6 + $0x30] sm:$0xff]   ;;  %s763_s23 = sshll.u32 %s1026_s8, 8  ;;  %s885_s28 = scalar_lea.vmem %s1147_s22, 256 }
  0x19   : > { %v1060_v1 = vld [vmem:[%s354_s29] sm:$0xff]  ;;  %v1063_v4 = vld [vmem:[%s354_s29 + $0x8] sm:$0xff]  ;;  %803 = vmatpush3.bf16.msra.mxu1 %v873_v23  ;;  %v877_v27 = vld [vmem:[%s1201_s6 + $0x18] sm:$0xff]   ;;  %s633_s29 = sld [smem:[#allocation2]]  ;;  %s1152_s26 = scalar_lea.hbm %s1204_s9, %s763_s23 }
  0x1a   : > { %v362_v3 = vadd.f32 %v1060_v1, %v358_v0  ;;  %v363_v5 = vadd.f32 %v1063_v4, %v359_v2  ;;  %804 = vmatprep.subr.bf16.mxu1 %v947_v7  ;;  %v875_v25 = vld [vmem:[%s1201_s6 + $0x28] sm:$0xff]   ;;  %v876_v26 = vld [vmem:[%s1201_s6 + $0x20] sm:$0xff]   ;;  %v878_v45 = vld [vmem:[%s1201_s6 + $0x10] sm:$0xff]   ;;  %p886_p11 = scmp.ne.s32.totalorder %s1147_s22, %s885_s28  ;;  %s949_s8 = smov [#allocation3]  }
  0x1b   : > { %785 = vmatpush3.bf16.msra.mxu0 %v866_v16  ;;  %v738_v36 = vld [vmem:[%s1197_s2] ss:$0 sm:$0xff]  ;;  %v879_v46 = vld [vmem:[%s1201_s6 + $0x8] sm:$0xff]  }
  0x1c   : > { %364 = vadd.xlane.f32.xlu0 %v362_v3  ;;  %786 = vmatprep.subr.bf16.mxu0 %v947_v7  ;;  %v739_v40 = vld [vmem:[%s1198_s3] ss:$0 sm:$0xff]  ;;  %p887_p12 = pnand %p886_p11, %p1043_p5 }
  0x1d   : > { %805 = vmatpush3.bf16.msra.mxu1 %v874_v24  ;;  %v880_v47 = vld [vmem:[%s1201_s6] sm:$0xff]  }
  0x1e   : > { %806 = vmatprep.subr.bf16.mxu1 %v947_v7  ;;  %v740_v48 = vld [vmem:[%s1200_s5] ss:$0 sm:$0xff]  ;;  %p888_p13 = pneg %p887_p12 }
  0x1f   : > { %787 = vmatpush3.bf16.msra.mxu0 %v867_v17  ;;  %v749_v58 = vld [vmem:[%s1202_s7] ss:$0 sm:$0xff]  ;;  %v634_v60 = vstv %s633_s29  ;;  %s889_s29 = sshll.u32 %s949_s8, 4  ;;  %s890_s29 = int_to_ptr.vmem [resolvable:$false] %s889_s29 }
  0x20   : > { %366 = vadd.xlane.f32.xlu0 %v363_v5  ;;  %788 = vmatprep.subr.bf16.mxu0 %v947_v7  ;;  %s891_s10 = scalar_lea.vmem %s890_s29, 512  ;;  %p892_p0 = scmp.lt.s32.totalorder %s1147_s22, %s890_s29 }
  0x21   : > { %807 = vmatpush3.bf16.msra.mxu1 %v875_v25  ;;  %p893_p1 = scmp.lt.s32.totalorder %s891_s10, %s885_s28 }
  0x22   : > { %808 = vmatprep.subr.bf16.mxu1 %v947_v7 }
  0x23   : > { %789 = vmatpush3.bf16.msra.mxu0 %v868_v18  ;;  %p894_p2 = por %p893_p1, %p892_p0 }
  0x24   : > { %790 = vmatprep.subr.bf16.mxu0 %v947_v7 }
  0x25   : > { %809 = vmatpush3.bf16.msra.mxu1 %v876_v26  ;;  %p895_p3 = pnand %p894_p2, %p888_p13 }
  0x26   : > { %810 = vmatprep.subr.bf16.mxu1 %v947_v7 }
  0x27   : > { %791 = vmatpush3.bf16.msra.mxu0 %v869_v19 }
  0x28   : > { %792 = vmatprep.subr.bf16.mxu0 %v947_v7 }
  0x29   : > { %811 = vmatpush3.bf16.msra.mxu1 %v877_v27 }
  0x2a   : > { %812 = vmatprep.subr.bf16.mxu1 %v947_v7 }
  0x2b   : > { %793 = vmatpush3.bf16.msra.mxu0 %v870_v20 }
  0x2c   : > { %794 = vmatprep.subr.bf16.mxu0 %v947_v7 }
  0x2d   : > { %813 = vmatpush3.bf16.msra.mxu1 %v878_v45 }
  0x2e   : > { %814 = vmatprep.subr.bf16.mxu1 %v947_v7 }
  0x2f   : > { %795 = vmatpush3.bf16.msra.mxu0 %v871_v21 }
  0x30   : > { %796 = vmatprep.subr.bf16.mxu0 %v947_v7 }
  0x31   : > { %815 = vmatpush3.bf16.msra.mxu1 %v879_v46 }
  0x32   : > { %816 = vmatprep.subr.bf16.mxu1 %v947_v7 }
  0x33   : > { %797 = vmatpush3.bf16.msra.mxu0 %v872_v22 }
  0x35   : > { %817 = vmatpush3.bf16.msra.mxu1 %v880_v47 }
  0xa5   : > { %v365_v8 = vpop.xlane.xlu0 %364 }
  0xa6   : > { %v369_v9 = vmul.f32 0.0078125, %v365_v8 }
  0xa8   : > { %v371_v10 = vsub.f32 %v362_v3, %v369_v9 }
  0xa9   : > { %v367_v11 = vpop.xlane.xlu0 %366 }
  0xaa   : > { %v370_v12 = vmul.f32 0.0078125, %v367_v11  ;;  %v373_v13 = vmul.f32 %v371_v10, %v371_v10 }
  0xac   : > { %v372_v14 = vsub.f32 %v363_v5, %v370_v12  ;;  %375 = vadd.xlane.f32.xlu1 %v373_v13 }
  0xae   : > { %v374_v15 = vmul.f32 %v372_v14, %v372_v14 }
  0xb0   : > { %377 = vadd.xlane.f32.xlu1 %v374_v15 }
 0x135   : > { %v376_v28 = vpop.xlane.xlu1 %375 }
 0x136   : > { %v379_v29 = vmul.f32 0.0078125, %v376_v28 }
 0x138   : > { %v381_v30 = vadd.f32 1e-05, %v379_v29 }
 0x139   : > { %v378_v31 = vpop.xlane.xlu1 %377 }
 0x13a   : > { %881 = vrsqrt.f32 %v381_v30  ;;  %v380_v32 = vmul.f32 0.0078125, %v378_v31 }
 0x13c   : > { %v382_v33 = vadd.f32 1e-05, %v380_v32 }
 0x13e   : > { %883 = vrsqrt.f32 %v382_v33 }
 0x147   : > { %v882_v34 = vpop.eup %881 }
 0x148   : > { %v385_v35 = vmul.f32 %v882_v34, %v371_v10 }
 0x14a   : > { %v394_v39 = vmul.f32 %v738_v36, %v385_v35 }
 0x14b   : > { %v884_v37 = vpop.eup %883 }
 0x14c   : > { %v386_v38 = vmul.f32 %v884_v37, %v372_v14  ;;  %v403_v42 = vadd.f32 %v739_v40, %v394_v39 }
 0x14e   : > { %v395_v41 = vmul.f32 %v738_v36, %v386_v38 }
 0x150   : > { %v404_v43 = vadd.f32 %v739_v40, %v395_v41 }
 0x152   : > { %v405_v44 = vpack.c.bf16 %v404_v43, %v403_v42 }
 0x154   : > { %799 = vmatmul.mubr.bf16.vlgmr.msra.gmra.mxu0 %v405_v44 }
 0x214   : > { %v511_v49 = vpop.f32.mrf.mxu0 }
 0x215   : > { %v512_v51 = vadd.f32 %v740_v48, %v511_v49 }
 0x216   : > { %v800_v50 = vpop.f32.mrf.mxu0 }
 0x217   : > { %v518_v55 = vmax.f32 %v512_v51, 0.0 }
 0x218   : > { %v514_v52 = vpop.f32.mrf.mxu0 }
 0x219   : > { %v515_v53 = vadd.f32 %v740_v48, %v514_v52 }
 0x21a   : > { %v801_v54 = vpop.f32.mrf.mxu0 }
 0x21b   : > { %v519_v56 = vmax.f32 %v515_v53, 0.0 }
 0x21d   : > { %v520_v57 = vpack.c.bf16 %v519_v56, %v518_v55 }
 0x21f   : > { %819 = vmatmul.mubr.bf16.vlgmr.msra.gmra.mxu1 %v520_v57 }
 0x2df   : > { %v626_v59 = vpop.f32.mrf.mxu1 }
 0x2e0   : > { %v627_v61 = vadd.f32 %v749_v58, %v626_v59 }
 0x2e1   : > { %v820_v62 = vpop.f32.mrf.mxu1 }
 0x2e2   : > { %v635_v63 = vmul.f32 %v634_v60, %v627_v61 }
 0x2e3   : > { %v629_v0 = vpop.f32.mrf.mxu1 }
 0x2e4   : > { %v637_v2 = vadd.f32 %v635_v63, %v1060_v1  ;;  %v630_v3 = vadd.f32 %v749_v58, %v629_v0 }
 0x2e5   : > { %v821_v5 = vpop.f32.mrf.mxu1 }
 0x2e6   : > { %639 = vst [vmem:[%s343_s18] sm:$0xff] %v637_v2  ;;  %v636_v6 = vmul.f32 %v634_v60, %v630_v3 }
 0x2e8   : > { %v638_v7 = vadd.f32 %v636_v6, %v1063_v4 }
 0x2ea   : > { %640 = vst [vmem:[%s343_s18 + $0x8] sm:$0xff] %v638_v7 }
 0x2eb   : > { %898 = shalt.err (!%p895_p3)
}
 0x2ec   : > { %s899_s30 = scalar_lea.hbm %s1152_s26, 256  ;;  %s903_s18 = scalar_lea.hbm %s1204_s9, 512 }
 0x2ed   : > { %p900_p4 = scmp.ne.s32.totalorder %s1152_s26, %s899_s30  ;;  %p904_p9 = scmp.lt.s32.totalorder %s1152_s26, %s1204_s9 }
 0x2ee   : > { %p905_p10 = scmp.lt.s32.totalorder %s903_s18, %s899_s30 }
 0x2ef   : > { %p901_p7 = pnand %p900_p4, %p1043_p5 }
 0x2f0   : > { %p906_p11 = por %p905_p10, %p904_p9 }
 0x2f1   : > { %p902_p8 = pneg %p901_p7 }
 0x2f3   : > { %p907_p12 = pnand %p906_p11, %p902_p8 }
 0x2f5   : > { %910 = shalt.err (!%p907_p12)
}
 0x2f6   : > { %s950_s25 = smov 128   ;;  %s951_s28 = smov 8  }
 0x2f7   : > { %822 = dma.vmem_to_hbm [thread:$0]  (%p1043_p5), %s1147_s22, 256, %s1152_s26, %s1155_s27, %s950_s25, %s950_s25, %s951_s28  }
 0x2f8 PF: > { %p828_p13 = scmp.ge.s32.totalorder %s945_s14, 2  ;;  %s670_s8 = sand.u32 1, %s933_s11  }
 0x2f9   : > { %s671_s29 = scalar_lea.sflag [#allocation4], %s670_s8 }
 0x2fa   : > { %p825_p0 = pnand %p828_p13, %p1047_p6 }
 0x2fc   : > { %p826_p1 = pneg %p825_p0 }
 0x2fe   : > { %928 = dma.done.wait (%p826_p1), %s671_s29, 256  }
 0x2ff   : > { %930 = vsyncadd (%p826_p1), %s671_s29, 4294967040  ;;  %p20_p2 = scmp.ge.s32.totalorder %s1030_s16, 4   ;;  %s1207_s11 = smov %s937_s12 }
 0x300   : > { %s1208_s12 = smov %s941_s13  ;;  %s1209_s13 = smov %s1041_s19 }
 0x301   : > { %s1210_s14 = smov %s1030_s16  ;;  %22 = sbr.rel (!%p20_p2) target bundleno = 5 (0x5), region = 94 }
 0x306   :  { %676 = vsyncpa [#allocation4], 1 }
 0x307   :  { %678 = vsyncpa [#allocation4 + $0x1], 1 }

</bundles_post_ra>
